<compile_context>
chip_gen: v6e
topology: v6e:2x2x1
jax: 0.10.0
libtpu: 0.0.40
codegen_flags: <defaults>
</compile_context>

<pallas_src>
import math

import jax
import jax.numpy as jnp
import numpy as np
from jax import lax
from jax.experimental import pallas as pl
from jax.experimental.pallas import tpu as pltpu

LN_EPS = 1e-5  # torch.nn.LayerNorm default


def transformer_encoder_kernel(x_ref, wqkv_ref, bqkv_ref, gamma_ref, beta_ref,
                               out_ref):
    f32 = jnp.float32
    bf16 = jnp.bfloat16
    Bt, S, YD = out_ref.shape

    # ---- fused Q/K/V projection: one [Bt*S, XD] @ [XD, 3*YD] MXU matmul ----
    x2d = x_ref[...]                                              # [Bt*S, XD] f32
    qkv = jnp.dot(x2d.astype(bf16), wqkv_ref[...],
                  preferred_element_type=f32) + bqkv_ref[...]     # [Bt*S, 3YD] f32

    # static lane slices at multiples of 128 -> no relayout
    q = qkv[:, 0 * YD:1 * YD].reshape(Bt, S, YD)
    k = qkv[:, 1 * YD:2 * YD].reshape(Bt, S, YD)
    v = qkv[:, 2 * YD:3 * YD].reshape(Bt, S, YD)

    # ---- scores = Q @ K^T / sqrt(y_dim), batch-local (bf16 operands) ----
    scores = jnp.einsum('bqd,bkd->bqk', q.astype(bf16), k.astype(bf16),
                        preferred_element_type=f32) * (1.0 / math.sqrt(YD))

    # ---- softmax over last axis (f32, max-stabilized, EUP reciprocal) ----
    m = jnp.max(scores, axis=-1, keepdims=True)
    e = jnp.exp(scores - m)
    att = e * pl.reciprocal(jnp.sum(e, axis=-1, keepdims=True), approx=True)

    # ---- y = att @ V (bf16 operands, f32 accumulate) ----
    y = jnp.einsum('bqk,bkd->bqd', att.astype(bf16), v.astype(bf16),
                   preferred_element_type=f32)                    # [Bt, S, YD] f32

    # ---- LayerNorm(y) + V residual (one-pass variance, f32) ----
    mean = jnp.mean(y, axis=-1, keepdims=True)
    mean_sq = jnp.mean(y * y, axis=-1, keepdims=True)
    var = mean_sq - mean * mean
    y_norm = (y - mean) * lax.rsqrt(var + LN_EPS)
    y_out = y_norm * gamma_ref[...] + beta_ref[...] + v

    # TODO(synk): nn.Dropout is identity at inference; the optional
    # MixedFC/SimpleFC sub-encoder is not constructed in the default config
    # (encoder=None), so it is not implemented here.
    out_ref[...] = y_out.astype(out_ref.dtype)


def transformer_encoder_forward(x, params, *, grid_steps=None):
    B, S, XD = x.shape
    YD = params['wq'].shape[1]

    # default: 2 "parallel" grid steps (uses both v7x cores; near-free on
    # single-TC v5e/v6e), falling back to 1 step if B is not even.
    if grid_steps is None:
        grid_steps = 2 if (B >= 2 and B % 2 == 0) else 1
    assert B % grid_steps == 0, "batch must divide evenly across grid steps"
    Bt = B // grid_steps

    # fuse QKV weights/biases at the wrapper level; weights fed to MXU as bf16
    w_qkv = jnp.concatenate([params['wq'], params['wk'], params['wv']],
                            axis=1).astype(jnp.bfloat16)          # [XD, 3YD]
    b_qkv = jnp.concatenate([params['bq'], params['bk'], params['bv']],
                            axis=1)                               # [1, 3YD] f32

    # lane-dense 2D view of x so the fused projection sees M = Bt*S rows
    x2d = x.reshape(B * S, XD)

    in_specs = [
        pl.BlockSpec((Bt * S, XD), lambda b: (b, 0)),     # x rows for this step
        pl.BlockSpec((XD, 3 * YD), lambda b: (0, 0)),     # fused QKV weight (resident)
        pl.BlockSpec((1, 3 * YD), lambda b: (0, 0)),      # fused QKV bias
        pl.BlockSpec((1, YD), lambda b: (0, 0)),          # LN gamma
        pl.BlockSpec((1, YD), lambda b: (0, 0)),          # LN beta
    ]
    out_specs = pl.BlockSpec((Bt, S, YD), lambda b: (b, 0, 0))

    # advisory cost hint for the XLA scheduler
    flops = int(2 * B * S * XD * 3 * YD          # fused QKV projection
                + 4 * B * S * S * YD             # scores + att@V
                + 12 * B * S * YD)               # softmax / LN elementwise
    transcendentals = int(B * S * S + 2 * B * S)
    bytes_accessed = int(4 * B * S * XD + 4 * B * S * YD
                         + 2 * XD * 3 * YD + 4 * 3 * YD + 4 * 2 * YD)

    return pl.pallas_call(
        transformer_encoder_kernel,
        grid=(grid_steps,),
        in_specs=in_specs,
        out_specs=out_specs,
        out_shape=jax.ShapeDtypeStruct((B, S, YD), jnp.float32),
        compiler_params=pltpu.CompilerParams(
            dimension_semantics=("parallel",)),
        cost_estimate=pl.CostEstimate(
            flops=flops,
            transcendentals=transcendentals,
            bytes_accessed=bytes_accessed),
    )(x2d, w_qkv, b_qkv, params['gamma'], params['beta'])


def init_params(key, x_dim, y_dim):
    """PyTorch-style Linear init (uniform +/- 1/sqrt(fan_in)); weights stored [in, out]."""
    ks = jax.random.split(key, 6)
    bound = 1.0 / math.sqrt(x_dim)

    def u(k, shape):
        return jax.random.uniform(k, shape, jnp.float32, -bound, bound)

    return {
        'wq': u(ks[0], (x_dim, y_dim)), 'bq': u(ks[1], (1, y_dim)),
        'wk': u(ks[2], (x_dim, y_dim)), 'bk': u(ks[3], (1, y_dim)),
        'wv': u(ks[4], (x_dim, y_dim)), 'bv': u(ks[5], (1, y_dim)),
        'gamma': jnp.ones((1, y_dim), jnp.float32),
        'beta': jnp.zeros((1, y_dim), jnp.float32),
    }


def transformer_encoder_ref(x, p):
    """Pure-JAX f32 reference of the PyTorch forward (encoder=None, eval mode)."""
    q = x @ p['wq'] + p['bq']
    k = x @ p['wk'] + p['bk']
    v = x @ p['wv'] + p['bv']
    scores = jnp.einsum('bsd,btd->bst', q, k) / math.sqrt(q.shape[-1])
    att = jax.nn.softmax(scores, axis=-1)
    y = jnp.einsum('bst,btd->bsd', att, v)
    mean = y.mean(-1, keepdims=True)
    var = jnp.square(y - mean).mean(-1, keepdims=True)
    y_norm = (y - mean) / jnp.sqrt(var + LN_EPS)
    return y_norm * p['gamma'] + p['beta'] + v


if __name__ == "__main__":
    # small shapes consistent with the module (batch, genes=seq, x_dim, y_dim)
    B, S, XD, YD = 4, 16, 64, 128

    key = jax.random.PRNGKey(0)
    k_x, k_p = jax.random.split(key)
    x = jax.random.normal(k_x, (B, S, XD), dtype=jnp.float32)
    params = init_params(k_p, XD, YD)

    out = transformer_encoder_forward(x, params)
    out = jax.block_until_ready(out)

    assert out.shape == (B, S, YD) and out.dtype == jnp.float32
    ref = jax.block_until_ready(transformer_encoder_ref(x, params))
    np.testing.assert_allclose(np.asarray(out), np.asarray(ref),
                               rtol=2e-2, atol=2e-2)
    print("KERNEL_OK")
</pallas_src>

<mosaic_0001>
module attributes {stable_mosaic.version = 11 : i64} {
  func.func @transformer_encoder_kernel(%arg0: i32, %arg1: memref<32x64xf32, #tpu.memory_space<vmem>>, %arg2: memref<64x384xbf16, #tpu.memory_space<vmem>>, %arg3: memref<1x384xf32, #tpu.memory_space<vmem>>, %arg4: memref<1x128xf32, #tpu.memory_space<vmem>>, %arg5: memref<1x128xf32, #tpu.memory_space<vmem>>, %arg6: memref<2x16x128xf32, #tpu.memory_space<vmem>>) attributes {dimension_semantics = [#tpu.dimension_semantics<parallel>], iteration_bounds = array<i64: 2>, scalar_prefetch = 0 : i64, scratch_operands = 0 : i64, tpu.core_type = #tpu.core_type<tc>, window_params = [{transform_indices = @transform_0, window_bounds = array<i64: 32, 64>}, {pipeline_mode = #tpu.pipeline_mode<synchronous>, transform_indices = @transform_1, window_bounds = array<i64: 64, 384>}, {pipeline_mode = #tpu.pipeline_mode<synchronous>, transform_indices = @transform_2, window_bounds = array<i64: 1, 384>}, {pipeline_mode = #tpu.pipeline_mode<synchronous>, transform_indices = @transform_3, window_bounds = array<i64: 1, 128>}, {pipeline_mode = #tpu.pipeline_mode<synchronous>, transform_indices = @transform_4, window_bounds = array<i64: 1, 128>}, {transform_indices = @transform_5, window_bounds = array<i64: 2, 16, 128>}]} {
    %c0 = arith.constant 0 : index
    %c0_0 = arith.constant 0 : index
    %0 = vector.load %arg1[%c0, %c0_0] : memref<32x64xf32, #tpu.memory_space<vmem>>, vector<32x64xf32>
    %1 = arith.truncf %0 : vector<32x64xf32> to vector<32x64xbf16>
    %c0_1 = arith.constant 0 : index
    %c0_2 = arith.constant 0 : index
    %2 = vector.load %arg2[%c0_1, %c0_2] : memref<64x384xbf16, #tpu.memory_space<vmem>>, vector<64x384xbf16>
    %cst = arith.constant dense<0.000000e+00> : vector<32x384xf32>
    %3 = tpu.matmul %1, %2, %cst {dimension_numbers = #tpu.dot_dimension_numbers<[1], [0], [0], [1], [0, 0, 1, 1], [], []>} : vector<32x64xbf16>, vector<64x384xbf16>, vector<32x384xf32> -> vector<32x384xf32>
    %c0_3 = arith.constant 0 : index
    %c0_4 = arith.constant 0 : index
    %4 = vector.load %arg3[%c0_3, %c0_4] : memref<1x384xf32, #tpu.memory_space<vmem>>, vector<1x384xf32>
    %5 = vector.broadcast %4 : vector<1x384xf32> to vector<32x384xf32>
    %6 = arith.addf %3, %5 : vector<32x384xf32>
    %7 = vector.extract_strided_slice %6 {offsets = [0, 0], sizes = [32, 128], strides = [1, 1]} : vector<32x384xf32> to vector<32x128xf32>
    %8 = vector.shape_cast %7 : vector<32x128xf32> to vector<2x16x128xf32>
    %9 = vector.extract_strided_slice %6 {offsets = [0, 128], sizes = [32, 128], strides = [1, 1]} : vector<32x384xf32> to vector<32x128xf32>
    %10 = vector.shape_cast %9 : vector<32x128xf32> to vector<2x16x128xf32>
    %11 = vector.extract_strided_slice %6 {offsets = [0, 256], sizes = [32, 128], strides = [1, 1]} : vector<32x384xf32> to vector<32x128xf32>
    %12 = vector.shape_cast %11 : vector<32x128xf32> to vector<2x16x128xf32>
    %13 = arith.truncf %8 : vector<2x16x128xf32> to vector<2x16x128xbf16>
    %14 = arith.truncf %10 : vector<2x16x128xf32> to vector<2x16x128xbf16>
    "tpu.trace_start"() <{level = 10 : i32, message = "bqd,bkd->bqk"}> : () -> ()
    %cst_5 = arith.constant dense<0.000000e+00> : vector<2x16x16xf32>
    %15 = tpu.matmul %13, %14, %cst_5 {dimension_numbers = #tpu.dot_dimension_numbers<[2], [2], [1], [1], [0, 0, 0, 1, 1, 1], [0], [0]>} : vector<2x16x128xbf16>, vector<2x16x128xbf16>, vector<2x16x16xf32> -> vector<2x16x16xf32>
    "tpu.trace_stop"() : () -> ()
    %cst_6 = arith.constant 0.0883883461 : f32
    %16 = vector.broadcast %cst_6 : f32 to vector<2x16x16xf32>
    %17 = arith.mulf %15, %16 : vector<2x16x16xf32>
    %cst_7 = arith.constant dense<0xFF800000> : vector<2x16xf32>
    %18 = vector.multi_reduction <maximumf>, %17, %cst_7 [2] : vector<2x16x16xf32> to vector<2x16xf32>
    %19 = vector.shape_cast %18 : vector<2x16xf32> to vector<2x16x1xf32>
    %20 = vector.broadcast %19 : vector<2x16x1xf32> to vector<2x16x16xf32>
    %21 = arith.subf %17, %20 : vector<2x16x16xf32>
    %22 = math.exp %21 : vector<2x16x16xf32>
    %cst_8 = arith.constant dense<0.000000e+00> : vector<2x16xf32>
    %23 = vector.multi_reduction <add>, %22, %cst_8 [2] : vector<2x16x16xf32> to vector<2x16xf32>
    %24 = vector.shape_cast %23 : vector<2x16xf32> to vector<2x16x1xf32>
    %25 = tpu.reciprocal %24 {approx = true} : vector<2x16x1xf32> -> vector<2x16x1xf32>
    %26 = vector.broadcast %25 : vector<2x16x1xf32> to vector<2x16x16xf32>
    %27 = arith.mulf %22, %26 : vector<2x16x16xf32>
    %28 = arith.truncf %27 : vector<2x16x16xf32> to vector<2x16x16xbf16>
    %29 = arith.truncf %12 : vector<2x16x128xf32> to vector<2x16x128xbf16>
    "tpu.trace_start"() <{level = 10 : i32, message = "bqk,bkd->bqd"}> : () -> ()
    %cst_9 = arith.constant dense<0.000000e+00> : vector<2x16x128xf32>
    %30 = tpu.matmul %28, %29, %cst_9 {dimension_numbers = #tpu.dot_dimension_numbers<[2], [1], [1], [2], [0, 0, 0, 1, 1, 2], [0], [0]>} : vector<2x16x16xbf16>, vector<2x16x128xbf16>, vector<2x16x128xf32> -> vector<2x16x128xf32>
    "tpu.trace_stop"() : () -> ()
    %cst_10 = arith.constant dense<0.000000e+00> : vector<2x16xf32>
    %31 = vector.multi_reduction <add>, %30, %cst_10 [2] : vector<2x16x128xf32> to vector<2x16xf32>
    %32 = vector.shape_cast %31 : vector<2x16xf32> to vector<2x16x1xf32>
    %cst_11 = arith.constant 1.280000e+02 : f32
    %33 = vector.broadcast %cst_11 : f32 to vector<2x16x1xf32>
    %34 = arith.divf %32, %33 : vector<2x16x1xf32>
    %35 = arith.mulf %30, %30 : vector<2x16x128xf32>
    %cst_12 = arith.constant dense<0.000000e+00> : vector<2x16xf32>
    %36 = vector.multi_reduction <add>, %35, %cst_12 [2] : vector<2x16x128xf32> to vector<2x16xf32>
    %37 = vector.shape_cast %36 : vector<2x16xf32> to vector<2x16x1xf32>
    %cst_13 = arith.constant 1.280000e+02 : f32
    %38 = vector.broadcast %cst_13 : f32 to vector<2x16x1xf32>
    %39 = arith.divf %37, %38 : vector<2x16x1xf32>
    %40 = arith.mulf %34, %34 : vector<2x16x1xf32>
    %41 = arith.subf %39, %40 : vector<2x16x1xf32>
    %42 = vector.broadcast %34 : vector<2x16x1xf32> to vector<2x16x128xf32>
    %43 = arith.subf %30, %42 : vector<2x16x128xf32>
    %cst_14 = arith.constant 9.99999974E-6 : f32
    %44 = vector.broadcast %cst_14 : f32 to vector<2x16x1xf32>
    %45 = arith.addf %41, %44 : vector<2x16x1xf32>
    %46 = math.rsqrt %45 : vector<2x16x1xf32>
    %47 = vector.broadcast %46 : vector<2x16x1xf32> to vector<2x16x128xf32>
    %48 = arith.mulf %43, %47 : vector<2x16x128xf32>
    %c0_15 = arith.constant 0 : index
    %c0_16 = arith.constant 0 : index
    %49 = vector.load %arg4[%c0_15, %c0_16] : memref<1x128xf32, #tpu.memory_space<vmem>>, vector<1x128xf32>
    %50 = vector.shape_cast %49 : vector<1x128xf32> to vector<1x1x128xf32>
    %51 = vector.broadcast %50 : vector<1x1x128xf32> to vector<2x16x128xf32>
    %52 = arith.mulf %48, %51 : vector<2x16x128xf32>
    %c0_17 = arith.constant 0 : index
    %c0_18 = arith.constant 0 : index
    %53 = vector.load %arg5[%c0_17, %c0_18] : memref<1x128xf32, #tpu.memory_space<vmem>>, vector<1x128xf32>
    %54 = vector.shape_cast %53 : vector<1x128xf32> to vector<1x1x128xf32>
    %55 = vector.broadcast %54 : vector<1x1x128xf32> to vector<2x16x128xf32>
    %56 = arith.addf %52, %55 : vector<2x16x128xf32>
    %57 = arith.addf %56, %12 : vector<2x16x128xf32>
    %c0_19 = arith.constant 0 : index
    %c0_20 = arith.constant 0 : index
    %c0_21 = arith.constant 0 : index
    %58 = vector.load %arg6[%c0_19, %c0_20, %c0_21] : memref<2x16x128xf32, #tpu.memory_space<vmem>>, vector<2x16x128xf32>
    tpu.vector_store %arg6[%c0_19, %c0_20, %c0_21], %57 {strides = array<i32>} : memref<2x16x128xf32, #tpu.memory_space<vmem>>, vector<2x16x128xf32>,
    return
  }
  func.func @transform_0(%arg0: i32) -> (i32, i32) {
    %c0_i32 = arith.constant 0 : i32
    %c0_i32_0 = arith.constant 0 : i32
    return %arg0, %c0_i32 : i32, i32
  }
  func.func @transform_1(%arg0: i32) -> (i32, i32) {
    %c0_i32 = arith.constant 0 : i32
    %c0_i32_0 = arith.constant 0 : i32
    %c0_i32_1 = arith.constant 0 : i32
    return %c0_i32, %c0_i32_0 : i32, i32
  }
  func.func @transform_2(%arg0: i32) -> (i32, i32) {
    %c0_i32 = arith.constant 0 : i32
    %c0_i32_0 = arith.constant 0 : i32
    %c0_i32_1 = arith.constant 0 : i32
    return %c0_i32, %c0_i32_0 : i32, i32
  }
  func.func @transform_3(%arg0: i32) -> (i32, i32) {
    %c0_i32 = arith.constant 0 : i32
    %c0_i32_0 = arith.constant 0 : i32
    %c0_i32_1 = arith.constant 0 : i32
    return %c0_i32, %c0_i32_0 : i32, i32
  }
  func.func @transform_4(%arg0: i32) -> (i32, i32) {
    %c0_i32 = arith.constant 0 : i32
    %c0_i32_0 = arith.constant 0 : i32
    %c0_i32_1 = arith.constant 0 : i32
    return %c0_i32, %c0_i32_0 : i32, i32
  }
  func.func @transform_5(%arg0: i32) -> (i32, i32, i32) {
    %c0_i32 = arith.constant 0 : i32
    %c0_i32_0 = arith.constant 0 : i32
    %c0_i32_1 = arith.constant 0 : i32
    return %arg0, %c0_i32, %c0_i32_0 : i32, i32, i32
  }
}

</mosaic_0001>

<bundles_post_ra>
// kernel: tpu_custom_call.1
= control target key start
LH: loop header
LB: loop body
LE: loop exit
PB: predicated region body
PF: predicated region fallthrough
CT: control target
= control target key end

     0   :  { %10 = vsyncpa [#allocation3], 0  ;;  %s1473_s0 = inlined_call_operand.hbm [shape: f32[64,64], index: 0, kind: input, shape index: {}]   ;;  %s1474_s1 = inlined_call_operand.hbm [shape: bf16[64,384], index: 1, kind: input, shape index: {}]   ;;  %s1475_s2 = inlined_call_operand.vmem [shape: f32[1,384], index: 2, kind: input, shape index: {}]   ;;  %s1476_s3 = inlined_call_operand.vmem [shape: f32[1,128], index: 3, kind: input, shape index: {}]   ;;  %s1477_s4 = inlined_call_operand.vmem [shape: f32[1,128], index: 4, kind: input, shape index: {}]   ;;  %s1478_s5 = inlined_call_operand.hbm [shape: f32[4,16,128], index: 5, kind: output, shape index: {}]  }
   0x1   :  { %12 = vsyncpa [#allocation3 + $0x1], 0 }
   0x2   :  { %13 = vsyncpa [#allocation6], 0 }
   0x3   :  { %14 = vsyncpa [#allocation4], 0 }
   0x4   :  { %16 = vsyncpa [#allocation4 + $0x1], 0  ;;  %s1243_s18 = smov 0   ;;  %s1245_s19 = smov 0  }
   0x5   :  { %s1247_s20 = smov 0   ;;  %s1249_s21 = smov 0  }
   0x6 LB: > { %s1264_s22 = sadd.s32 4294967295, %s1199_s21   ;;  %s881_s23 = sadd.s32 4294967294, %s1199_s21   ;;  %s1199_s21 = sphi %s1249_s21, %s1500_s21   ;;  %s1195_s20 = sphi %s1247_s20, %s1499_s20   ;;  %s1191_s19 = sphi %s1245_s19, %s1498_s19   ;;  %s1187_s18 = sphi %s1243_s18, %s1497_s18  }
   0x7   : > { %p42_p0 = scmp.ne.s32.totalorder %s1191_s19, %s1187_s18  ;;  %p1479_p1 = scmp.eq.s32.totalorder %s1264_s22, 0 }
   0x8   : > { %p156_p3 = scmp.eq.s32.totalorder %s881_s23, 1  ;;  %p882_p5 = scmp.ge.s32.totalorder %s1199_s21, 1 }
   0x9   : > { %p1273_p4 = por %p1479_p1, %p42_p0  ;;  %p163_p7 = scmp.lt.s32.totalorder %s1199_s21, 3 }
   0xa   : > { %p1278_p6 = por %p156_p3, %p42_p0  ;;  %s1201_s27 = smov [#allocation5]  }
   0xb   : > { %s1483_s24 = scalar_select %p1273_p4, 1, 0 }
   0xc   : > { %s1484_s25 = scalar_select %p1278_p6, 1, 0 }
   0xd   : > { %p1283_p8 = pnand %p882_p5, %p163_p7  ;;  %s175_s28 = sshll.u32 %s1201_s27, 4  ;;  %s176_s28 = int_to_ptr.vmem [resolvable:$true] %s175_s28 }
   0xe   : > { %s1297_s30 = sadd.s32 1, %s1199_s21   ;;  %s29_s6 = sadd.s32 1, %s1195_s20 }
   0xf   : > { %s1485_s26 = scalar_select %p1283_p8, 1, 0 }
  0x10   : > { %p979_p9 = pneg %p1283_p8  ;;  %s26_s7 = ssub.s32 %s1199_s21, %s1297_s30 }
  0x11   : > { %s1088_s8 = scalar_lea.vmem %s176_s28, 1536  ;;  %p1096_p5 = scmp.lt.s32.totalorder %s176_s28, %s176_s28 }
  0x12   : > { %p1292_p11 = pnand %p979_p9, %p1479_p1  ;;  %p1089_p13 = scmp.ne.s32.totalorder %s176_s28, %s1088_s8 }
  0x13   : > { %p1097_p7 = scmp.lt.s32.totalorder %s1088_s8, %s1088_s8 }
  0x14   : > { %p1079_p12 = pneg %p1292_p11 }
  0x15   : > { %p1098_p10 = por %p1097_p7, %p1096_p5 }
  0x16   : > { %p1091_p0 = pnand %p1089_p13, %p1079_p12 }
  0x18   : > { %p1092_p3 = pneg %p1091_p0 }
  0x1a   : > { %p1099_p2 = pnand %p1098_p10, %p1092_p3 }
  0x1c   : > { %1102 = shalt.err (!%p1099_p2)
}
  0x1d   : > { %s1202_s9 = smov 192   ;;  %s1203_s10 = smov 12  }
  0x1e   : > { %982 = dma.hbm_to_vmem [thread:$0]  (!%p1292_p11), %s1474_s1, 1536, %s176_s28, [#allocation6], %s1202_s9, %s1202_s9, %s1203_s10  }
  0x1f   : > { %p27_p9 = scmp.eq.s32.totalorder %s26_s7, 0  ;;  %p36_p12 = scmp.ne.s32.totalorder %s1195_s20, %s1191_s19 }
  0x20   : > { %p37_p10 = scmp.eq.s32.totalorder %s1199_s21, 0  ;;  %p992_p2 = scmp.lt.s32.totalorder %s1199_s21, 2 }
  0x21   : > { %s1314_s13 = scalar_select %p27_p9, %s1195_s20, %s29_s6  }
  0x22   : > { %p38_p13 = por %p37_p10, %p36_p12  ;;  %p1487_p0 = scmp.eq.s32.totalorder %s1264_s22, 1 }
  0x23   : > { %s198_s15 = sand.u32 1, %s1195_s20   ;;  %s918_s16 = sshll.u32 %s1199_s21, 9 }
  0x24   : > { %p1318_p3 = por %p1487_p0, %p36_p12  ;;  %s885_s17 = sshll.u32 %s198_s15, 5 }
  0x25   : > { %s1327_s29 = scalar_lea.hbm %s1473_s0, %s918_s16  ;;  %s202_s28 = scalar_lea.vmem [#allocation2], %s885_s17 }
  0x26   : > { %s1488_s14 = scalar_select %p1318_p3, 1, 0 }
  0x27   : > { %s209_s6 = sshll.u32 %s202_s28, 4  ;;  %p1329_p11 = pnand %p992_p2, %p38_p13  ;;  %s1333_s6 = int_to_ptr.vmem [resolvable:$true] %s209_s6 }
  0x28   : > { %s1335_s8 = scalar_lea.sflag [#allocation3], %s198_s15  ;;  %s1103_s9 = scalar_lea.hbm %s1327_s29, 512 }
  0x29   : > { %p1104_p5 = scmp.ne.s32.totalorder %s1327_s29, %s1103_s9  ;;  %p1105_p7 = pneg %p1329_p11 }
  0x2a   : > { %s1108_s12 = scalar_lea.hbm %s1473_s0, 1024  ;;  %p1109_p10 = scmp.lt.s32.totalorder %s1327_s29, %s1473_s0 }
  0x2b   : > { %p1106_p9 = pnand %p1105_p7, %p1104_p5  ;;  %p1110_p2 = scmp.lt.s32.totalorder %s1108_s12, %s1103_s9 }
  0x2d   : > { %p1107_p12 = pneg %p1106_p9  ;;  %p1111_p13 = por %p1110_p2, %p1109_p10 }
  0x2f   : > { %p1112_p0 = pnand %p1111_p13, %p1107_p12 }
  0x31   : > { %1115 = shalt.err (!%p1112_p0)
}
  0x32   : > { %s1116_s15 = scalar_lea.vmem %s1333_s6, 512  ;;  %s1204_s23 = smov [#allocation2]  }
  0x33   : > { %p1117_p1 = scmp.ne.s32.totalorder %s1333_s6, %s1116_s15  ;;  %s1121_s27 = sshll.u32 %s1204_s23, 4  ;;  %s1122_s27 = int_to_ptr.vmem [resolvable:$false] %s1121_s27 }
  0x34   : > { %s1123_s28 = scalar_lea.vmem %s1122_s27, 1024  ;;  %p1124_p9 = scmp.lt.s32.totalorder %s1333_s6, %s1122_s27 }
  0x35   : > { %p1119_p6 = pnand %p1117_p1, %p1105_p7  ;;  %p1125_p3 = scmp.lt.s32.totalorder %s1123_s28, %s1116_s15 }
  0x37   : > { %p1120_p5 = pneg %p1119_p6  ;;  %p1126_p4 = por %p1125_p3, %p1124_p9 }
  0x39   : > { %p1127_p8 = pnand %p1126_p4, %p1120_p5 }
  0x3b   : > { %1130 = shalt.err (!%p1127_p8)
}
  0x3c   : > { %s1205_s9 = smov 128   ;;  %s1206_s10 = smov 8  }
  0x3d   : > { %986 = dma.hbm_to_vmem [thread:$0]  (!%p1329_p11), %s1327_s29, 512, %s1333_s6, %s1335_s8, %s1205_s9, %s1205_s9, %s1206_s10  }
  0x3e   : > { %p1490_p1 = scmp.ne.s32.totalorder %s1485_s26, 0 }
  0x3f   : > { %s1359_s11 = sand.u32 (!%p1490_p1), 1, %s1191_s19   ;;  %p1491_p4 = scmp.ne.s32.totalorder (!%p1490_p1), %s1483_s24, 0 }
  0x40   : > { %221 = sbr.rel (%p1490_p1) target bundleno = 1202 (0x4b2), region = 40  ;;  %s889_s12 = sshll.u32 (!%p1490_p1), %s1359_s11, 5 }
  0x41   : > { %s224_s16 = scalar_lea.sflag (!%p1490_p1), [#allocation3], %s1359_s11  ;;  %s1365_s17 = scalar_lea.vmem (!%p1490_p1), [#allocation2], %s889_s12 }
  0x45   : > { %1174 = dma.done.wait (%p1491_p4), %s224_s16, 512  }
  0x46   : > { %1176 = vsyncadd (%p1491_p4), %s224_s16, 4294966784  ;;  %p1492_p6 = scmp.eq.s32.totalorder %s1264_s22, 0 }
  0x48   : > { %1178 = dma.done.wait (%p1492_p6), [#allocation6], 1536   ;;  %p1493_p8 = pmov %p1492_p6 }
  0x49   : > { %v1207_v0 = vmov 0   ;;  %v1037_v1 = vld [vmem:[#allocation5 + $0x4c] ss:$12 sps:$4 sm:$0xff]   ;;  %v1039_v2 = vld [vmem:[#allocation5 + $0x48] ss:$12 sps:$4 sm:$0xff]   ;;  %v261_v6 = vld [vmem:[%s1365_s17] sm:$0xff]  ;;  %v285_v20 = vlaneseq }
  0x4a   : > { %1180 = vsyncadd (%p1493_p8), [#allocation6], 4294965760  ;;  %403 = vmatprep.mubr.bf16.mxu0 %v1207_v0  ;;  %379 = vmatprep.subr.bf16.mxu0 %v1037_v1  ;;  %v1040_v3 = vld [vmem:[#allocation5 + $0x34] ss:$12 sps:$4 sm:$0xff]   ;;  %v1042_v4 = vld [vmem:[#allocation5 + $0x30] ss:$12 sps:$4 sm:$0xff]  }
  0x4b   : > { %380 = vmatpush1.bf16.msra.mxu0 %v1039_v2  ;;  %v1043_v5 = vld [vmem:[#allocation5 + $0x1c] ss:$12 sps:$4 sm:$0xff]   ;;  %v1045_v8 = vld [vmem:[#allocation5 + $0x18] ss:$12 sps:$4 sm:$0xff]   ;;  %vm364_vm0 = vcmask 523264   ;;  %v263_v14 = vld [vmem:[%s1365_s17 + $0x10] sm:$0xff] }
  0x4c   : > { %381 = vmatprep.subr.bf16.mxu0 %v1040_v3  ;;  %v262_v7 = vld [vmem:[%s1365_s17 + $0x8] sm:$0xff]  ;;  %v1049_v10 = vld [vmem:[#allocation5 + $0x50] ss:$12 sps:$4 sm:$0xff]   ;;  %v1050_v12 = vld [vmem:[#allocation5 + $0x38] ss:$12 sps:$4 sm:$0xff]   ;;  %v1208_v19 = vmov 0.0  }
  0x4d   : > { %v265_v9 = vpack.c.bf16 %v262_v7, %v261_v6  ;;  %v1046_v11 = vld [vmem:[#allocation5 + $0x4] ss:$12 sps:$4 sm:$0xff]   ;;  %935 = vmatprep.subr.bf16.mxu1 %v1049_v10  ;;  %v1048_v13 = vld [vmem:[#allocation5] ss:$12 sps:$4 sm:$0xff]   ;;  %v264_v15 = vld [vmem:[%s1365_s17 + $0x18] sm:$0xff]  ;;  %vm1209_vm1 = vmmov 0  }
  0x4e   : > { %936 = vmatpush3.bf16.msra.mxu1 %v1049_v10  ;;  %v266_v16 = vpack.c.bf16 %v264_v15, %v263_v14  ;;  %v1051_v17 = vld [vmem:[#allocation5 + $0x20] ss:$12 sps:$4 sm:$0xff]   ;;  %v1052_v18 = vld [vmem:[#allocation5 + $0x8] ss:$12 sps:$4 sm:$0xff]   ;;  %v286_v21 = vshrl.u32 %v285_v20, 7  ;;  %vm563_vm2 = vcmask 130048  }
  0x4f   : > { %382 = vmatpush1.bf16.msra.mxu0 %v1042_v4  ;;  %943 = vmatprep.mubr.msk.bf16.mxu1 %vm364_vm0, %v265_v9  ;;  %v283_v24 = vld [vmem:[%s1475_s2] sm:$0x7]  ;;  %s257_s15 = scalar_lea.vmem [#allocation7], %s889_s12  ;;  %s920_s23 = sshll.u32 %s1264_s22, 9 }
  0x50   : > { %383 = vmatprep.subr.bf16.mxu0 %v1043_v5  ;;  %937 = vmatprep.subr.bf16.mxu1 %v1050_v12  ;;  %v291_v22 = vsub.s32 1, %v286_v21  ;;  %v287_v28 = vsub.s32 0, %v286_v21  ;;  %v295_v47 = vsub.s32 2, %v286_v21  ;;  %s798_s27 = sshll.u32 %s257_s15, 4  ;;  %s1427_s10 = scalar_lea.hbm %s1478_s5, %s920_s23  ;;  %s1429_s27 = int_to_ptr.vmem [resolvable:$true] %s798_s27 }
  0x51   : > { %s784_s12 = scalar_lea.sflag [#allocation4], %s1359_s11  ;;  %s1131_s16 = scalar_lea.vmem %s1429_s27, 512 }
  0x52   : > { %938 = vmatpush3.bf16.msra.mxu1 %v1050_v12  ;;  %v292_v26 = vrot.slane %v283_v24, %v291_v22  ;;  %v288_v34 = vrot.slane %v283_v24, %v287_v28  ;;  %v296_v48 = vrot.slane %v283_v24, %v295_v47  ;;  %p1132_p3 = scmp.ne.s32.totalorder %s1429_s27, %s1131_s16  ;;  %p1494_p11 = scmp.ne.s32.totalorder %s1488_s14, 0 }
  0x53   : > { %384 = vmatpush1.bf16.msra.mxu0 %v1045_v8  ;;  %939 = vmatprep.subr.bf16.mxu1 %v1051_v17  ;;  %s1210_s22 = smov [#allocation7]  }
  0x54   : > { %385 = vmatprep.subr.bf16.mxu0 %v1046_v11  ;;  %p1133_p7 = pnand %p1132_p3, %p1494_p11  ;;  %s1135_s17 = sshll.u32 %s1210_s22, 4  ;;  %s1136_s17 = int_to_ptr.vmem [resolvable:$false] %s1135_s17 }
  0x55   : > { %s1137_s24 = scalar_lea.vmem %s1136_s17, 1024  ;;  %p1138_p10 = scmp.lt.s32.totalorder %s1429_s27, %s1136_s17 }
  0x56   : > { %940 = vmatpush3.bf16.msra.mxu1 %v1051_v17  ;;  %p1134_p12 = pneg %p1133_p7  ;;  %p1139_p2 = scmp.lt.s32.totalorder %s1137_s24, %s1131_s16 }
  0x57   : > { %386 = vmatpush1.bf16.msra.mxu0 %v1048_v13  ;;  %941 = vmatprep.subr.bf16.mxu1 %v1052_v18 }
  0x58   : > { %953 = vmatprep.subr.bf16.mxu0 %v1208_v19  ;;  %p1140_p13 = por %p1139_p2, %p1138_p10 }
  0x5a   : > { %904 = vmatmul.mubr.msk.bf16.vlgmr.msra.gmra.mxu0 %vm364_vm0, %v265_v9  ;;  %942 = vmatpush3.bf16.msra.mxu1 %v1052_v18  ;;  %p1141_p0 = pnand %p1140_p13, %p1134_p12 }
  0x5b   : > { %413 = vmatprep.mubr.bf16.mxu0 %v1207_v0  ;;  %947 = vmatprep.subr.bf16.mxu1 %v1208_v19 }
  0x5d   : > { %944 = vmatmul.mubr.msk.bf16.vlgmr.msra.gmra.mxu1 %vm364_vm0, %v266_v16 }
  0x5e   : > { %949 = vmatprep.mubr.msk.bf16.mxu1 %vm1209_vm1, %v1208_v19 }
  0x62   : > { %905 = vmatmul.mubr.msk.bf16.gmra.mxu0 %vm364_vm0, %v266_v16 }
  0x63   : > { %955 = vmatprep.mubr.msk.bf16.mxu0 %vm1209_vm1, %v1208_v19 }
 0x11a   : > { %v405_v23 = vpop.f32.mrf.mxu0 }
 0x11b   : > { %v406_v38 = vadd.f32 %v405_v23, %v288_v34 }
 0x11c   : > { %v407_v25 = vpop.f32.mrf.mxu0 }
 0x11d   : > { %v408_v30 = vadd.f32 %v407_v25, %v292_v26  ;;  %v945_v49 = vpop.f32.mrf.mxu1 }
 0x11e   : > { %v409_v27 = vpop.f32.mrf.mxu0  ;;  %v1390_v51 = vadd.f32 %v945_v49, %v296_v48 }
 0x11f   : > { %v410_v36 = vadd.f32 %v409_v27, %v288_v34  ;;  %v458_v50 = vpop.f32.mrf.mxu1 }
 0x120   : > { %v411_v29 = vpop.f32.mrf.mxu0  ;;  %v1392_v53 = vadd.f32 %v458_v50, %v296_v48 }
 0x121   : > { %v412_v31 = vadd.f32 %v411_v29, %v292_v26  ;;  %v473_v42 = vpack.c.bf16 %v410_v36, %v406_v38  ;;  %v946_v52 = vpop.f32.mrf.mxu1 }
 0x122   : > { %v415_v32 = vpop.f32.mrf.mxu0  ;;  %v1394_v54 = vadd.f32 %v946_v52, %v296_v48 }
 0x123   : > { %v475_v33 = vpack.c.bf16 %v412_v31, %v408_v30  ;;  %v416_v45 = vadd.f32 %v415_v32, %v288_v34  ;;  %v461_v55 = vpop.f32.mrf.mxu1 }
 0x124   : > { %v417_v35 = vpop.f32.mrf.mxu0  ;;  %v611_v56 = vpack.c.bf16 %v1394_v54, %v1390_v51  ;;  %v1398_v57 = vadd.f32 %v461_v55, %v296_v48 }
 0x125   : > { %948 = vmatpush3.bf16.xpose.msra.mxu1 %v475_v33  ;;  %v418_v40 = vadd.f32 %v417_v35, %v292_v26 }
 0x126   : > { %v419_v37 = vpop.f32.mrf.mxu0  ;;  %959 = vmatprep.subr.bf16.mxu1 %v1208_v19  ;;  %v610_v58 = vpack.c.bf16 %v1398_v57, %v1392_v53 }
 0x127   : > { %v420_v44 = vadd.f32 %v419_v37, %v288_v34 }
 0x128   : > { %v421_v39 = vpop.f32.mrf.mxu0 }
 0x129   : > { %v422_v41 = vadd.f32 %v421_v39, %v292_v26  ;;  %v474_v46 = vpack.c.bf16 %v420_v44, %v416_v45 }
 0x12b   : > { %v476_v43 = vpack.c.bf16 %v422_v41, %v418_v40 }
 0x12c   : > { %950 = vmatmul.mubr.bf16.vlgmr.msra.gmra.mxu1 %v473_v42 }
 0x12d   : > { %954 = vmatpush3.bf16.xpose.msra.mxu0 %v476_v43  ;;  %961 = vmatprep.mubr.msk.bf16.mxu1 %vm1209_vm1, %v1208_v19 }
 0x12e   : > { %965 = vmatprep.subr.bf16.mxu0 %v1208_v19  ;;  %960 = vmatpush3.bf16.msra.mxu1 %v610_v58 }
 0x134   : > { %956 = vmatmul.mubr.bf16.vlgmr.msra.gmra.mxu0 %v474_v46 }
 0x135   : > { %967 = vmatprep.mubr.msk.bf16.mxu0 %vm1209_vm1, %v1208_v19  ;;  %966 = vmatpush3.bf16.msra.mxu0 %v611_v56 }
 0x1ec   : > { %v511_v59 = vpop.f32.mrf.mxu1 }
 0x1ed   : > { %v559_v60 = vmul.f32 0.088388346, %v511_v59 }
 0x1ee   : > { %v951_v61 = vpop.f32.mrf.mxu1 }
 0x1ef   : > { %v564_v62 = vsel %vm563_vm2, %v559_v60, -inf }
 0x1f0   : > { %565 = vmax.xlane.f32.xlu0 %v564_v62  ;;  %v514_v63 = vpop.f32.mrf.mxu1 }
 0x1f1   : > { %v560_v0 = vmul.f32 0.088388346, %v514_v63 }
 0x1f2   : > { %v952_v1 = vpop.f32.mrf.mxu1 }
 0x1f3   : > { %v567_v2 = vsel %vm563_vm2, %v560_v0, -inf }
 0x1f4   : > { %v552_v3 = vpop.f32.mrf.mxu0  ;;  %568 = vmax.xlane.f32.xlu0 %v567_v2 }
 0x1f5   : > { %v561_v4 = vmul.f32 0.088388346, %v552_v3 }
 0x1f6   : > { %v957_v5 = vpop.f32.mrf.mxu0 }
 0x1f7   : > { %v570_v6 = vsel %vm563_vm2, %v561_v4, -inf }
 0x1f8   : > { %571 = vmax.xlane.f32.xlu1 %v570_v6  ;;  %v555_v7 = vpop.f32.mrf.mxu0 }
 0x1f9   : > { %v562_v8 = vmul.f32 0.088388346, %v555_v7 }
 0x1fa   : > { %v958_v9 = vpop.f32.mrf.mxu0 }
 0x1fb   : > { %v573_v10 = vsel %vm563_vm2, %v562_v8, -inf }
 0x1fc   : > { %574 = vmax.xlane.f32.xlu1 %v573_v10 }
 0x279   : > { %v566_v11 = vpop.xlane.xlu0 %565 }
 0x27a   : > { %v576_v12 = vsub.f32 %v559_v60, %v566_v11 }
 0x27c   : > { %v580_v13 = vmul.f32 1.442695, %v576_v12 }
 0x27d   : > { %v569_v14 = vpop.xlane.xlu0 %568 }
 0x27e   : > { %1053 = vpow2.f32 %v580_v13  ;;  %v577_v15 = vsub.f32 %v560_v0, %v569_v14 }
 0x280   : > { %v582_v16 = vmul.f32 1.442695, %v577_v15 }
 0x281   : > { %v572_v17 = vpop.xlane.xlu1 %571 }
 0x282   : > { %1055 = vpow2.f32 %v582_v16  ;;  %v578_v18 = vsub.f32 %v561_v4, %v572_v17 }
 0x284   : > { %v584_v19 = vmul.f32 1.442695, %v578_v18 }
 0x285   : > { %v575_v20 = vpop.xlane.xlu1 %574 }
 0x286   : > { %1057 = vpow2.f32 %v584_v19  ;;  %v579_v21 = vsub.f32 %v562_v8, %v575_v20 }
 0x288   : > { %v586_v22 = vmul.f32 1.442695, %v579_v21 }
 0x28a   : > { %1059 = vpow2.f32 %v586_v22 }
 0x28b   : > { %v1054_v23 = vpop.eup %1053 }
 0x28c   : > { %v588_v24 = vsel %vm563_vm2, %v1054_v23, 0.0 }
 0x28d   : > { %589 = vadd.xlane.f32.xlu0 %v588_v24 }
 0x28f   : > { %v1056_v25 = vpop.eup %1055 }
 0x290   : > { %v591_v26 = vsel %vm563_vm2, %v1056_v25, 0.0 }
 0x291   : > { %592 = vadd.xlane.f32.xlu1 %v591_v26 }
 0x293   : > { %v1058_v27 = vpop.eup %1057 }
 0x294   : > { %v594_v28 = vsel %vm563_vm2, %v1058_v27, 0.0 }
 0x295   : > { %595 = vadd.xlane.f32.xlu0 %v594_v28 }
 0x297   : > { %v1060_v29 = vpop.eup %1059 }
 0x298   : > { %v597_v30 = vsel %vm563_vm2, %v1060_v29, 0.0 }
 0x299   : > { %598 = vadd.xlane.f32.xlu1 %v597_v30 }
 0x316   : > { %v590_v31 = vpop.xlane.xlu0 %589 }
 0x317   : > { %1061 = vrcp.f32 %v590_v31 }
 0x31a   : > { %v593_v32 = vpop.xlane.xlu1 %592 }
 0x31b   : > { %1063 = vrcp.f32 %v593_v32 }
 0x31e   : > { %v596_v33 = vpop.xlane.xlu0 %595 }
 0x31f   : > { %1065 = vrcp.f32 %v596_v33 }
 0x322   : > { %v599_v34 = vpop.xlane.xlu1 %598 }
 0x323   : > { %1067 = vrcp.f32 %v599_v34 }
 0x324   : > { %v1062_v35 = vpop.eup %1061 }
 0x325   : > { %v604_v37 = vmul.f32 %v1062_v35, %v1054_v23 }
 0x328   : > { %v1064_v36 = vpop.eup %1063 }
 0x329   : > { %v605_v38 = vmul.f32 %v1064_v36, %v1056_v25 }
 0x32b   : > { %v608_v39 = vpack.c.bf16 %v605_v38, %v604_v37 }
 0x32c   : > { %v1066_v40 = vpop.eup %1065 }
 0x32d   : > { %962 = vmatmul.mubr.msk.bf16.vlgmr.msra.gmra.mxu1 %vm563_vm2, %v608_v39  ;;  %v606_v42 = vmul.f32 %v1066_v40, %v1058_v27  ;;  %v910_v27 = vld [vmem:[%s1476_s3] ss:$0 sm:$0xff] }
 0x330   : > { %v1068_v41 = vpop.eup %1067 }
 0x331   : > { %v607_v43 = vmul.f32 %v1068_v41, %v1060_v29  ;;  %v911_v29 = vld [vmem:[%s1477_s4] ss:$0 sm:$0xff] }
 0x333   : > { %v609_v44 = vpack.c.bf16 %v607_v43, %v606_v42 }
 0x335   : > { %968 = vmatmul.mubr.msk.bf16.vlgmr.msra.gmra.mxu0 %vm563_vm2, %v609_v44 }
 0x3ed   : > { %v649_v45 = vpop.f32.mrf.mxu1 }
 0x3ee   : > { %700 = vadd.xlane.f32.xlu0 %v649_v45  ;;  %v713_v47 = vmul.f32 %v649_v45, %v649_v45 }
 0x3ef   : > { %v963_v46 = vpop.f32.mrf.mxu1 }
 0x3f1   : > { %v652_v48 = vpop.f32.mrf.mxu1 }
 0x3f2   : > { %717 = vadd.xlane.f32.xlu0 %v713_v47  ;;  %702 = vadd.xlane.f32.xlu1 %v652_v48  ;;  %v714_v50 = vmul.f32 %v652_v48, %v652_v48 }
 0x3f3   : > { %v964_v49 = vpop.f32.mrf.mxu1 }
 0x3f5   : > { %v693_v52 = vpop.f32.mrf.mxu0 }
 0x3f6   : > { %704 = vadd.xlane.f32.xlu0 %v693_v52  ;;  %719 = vadd.xlane.f32.xlu1 %v714_v50  ;;  %v715_v56 = vmul.f32 %v693_v52, %v693_v52 }
 0x3f7   : > { %v969_v55 = vpop.f32.mrf.mxu0 }
 0x3f9   : > { %v696_v58 = vpop.f32.mrf.mxu0 }
 0x3fa   : > { %721 = vadd.xlane.f32.xlu0 %v715_v56  ;;  %706 = vadd.xlane.f32.xlu1 %v696_v58  ;;  %v716_v60 = vmul.f32 %v696_v58, %v696_v58 }
 0x3fb   : > { %v970_v59 = vpop.f32.mrf.mxu0 }
 0x3fe   : > { %723 = vadd.xlane.f32.xlu1 %v716_v60 }
 0x477   : > { %v701_v61 = vpop.xlane.xlu0 %700 }
 0x478   : > { %v709_v62 = vmul.f32 0.0078125, %v701_v61 }
 0x47a   : > { %v729_v1 = vmul.f32 %v709_v62, %v709_v62  ;;  %v737_v25 = vsub.f32 %v649_v45, %v709_v62 }
 0x47b   : > { %v718_v63 = vpop.xlane.xlu0 %717  ;;  %v703_v0 = vpop.xlane.xlu1 %702 }
 0x47c   : > { %v725_v2 = vmul.f32 0.0078125, %v718_v63  ;;  %v710_v3 = vmul.f32 0.0078125, %v703_v0 }
 0x47e   : > { %v733_v4 = vsub.f32 %v725_v2, %v729_v1  ;;  %v730_v8 = vmul.f32 %v710_v3, %v710_v3  ;;  %v738_v31 = vsub.f32 %v652_v48, %v710_v3 }
 0x47f   : > { %v705_v5 = vpop.xlane.xlu0 %704  ;;  %v720_v6 = vpop.xlane.xlu1 %719 }
 0x480   : > { %v741_v7 = vadd.f32 1e-05, %v733_v4  ;;  %v711_v9 = vmul.f32 0.0078125, %v705_v5  ;;  %v726_v10 = vmul.f32 0.0078125, %v720_v6 }
 0x482   : > { %1069 = vrsqrt.f32 %v741_v7  ;;  %v734_v11 = vsub.f32 %v726_v10, %v730_v8  ;;  %v731_v14 = vmul.f32 %v711_v9, %v711_v9  ;;  %v739_v36 = vsub.f32 %v693_v52, %v711_v9 }
 0x483   : > { %v722_v12 = vpop.xlane.xlu0 %721  ;;  %v707_v13 = vpop.xlane.xlu1 %706 }
 0x484   : > { %v742_v15 = vadd.f32 1e-05, %v734_v11  ;;  %v727_v16 = vmul.f32 0.0078125, %v722_v12  ;;  %v712_v17 = vmul.f32 0.0078125, %v707_v13 }
 0x486   : > { %1071 = vrsqrt.f32 %v742_v15  ;;  %v735_v18 = vsub.f32 %v727_v16, %v731_v14  ;;  %v732_v21 = vmul.f32 %v712_v17, %v712_v17  ;;  %v740_v43 = vsub.f32 %v696_v58, %v712_v17 }
 0x487   : > { %v724_v19 = vpop.xlane.xlu1 %723 }
 0x488   : > { %v743_v20 = vadd.f32 1e-05, %v735_v18  ;;  %v728_v22 = vmul.f32 0.0078125, %v724_v19 }
 0x48a   : > { %1073 = vrsqrt.f32 %v743_v20  ;;  %v736_v23 = vsub.f32 %v728_v22, %v732_v21 }
 0x48c   : > { %v744_v24 = vadd.f32 1e-05, %v736_v23 }
 0x48e   : > { %1075 = vrsqrt.f32 %v744_v24 }
 0x48f   : > { %v1070_v26 = vpop.eup %1069 }
 0x490   : > { %v749_v28 = vmul.f32 %v1070_v26, %v737_v25 }
 0x492   : > { %v760_v30 = vmul.f32 %v910_v27, %v749_v28 }
 0x493   : > { %v1072_v32 = vpop.eup %1071 }
 0x494   : > { %v771_v33 = vadd.f32 %v911_v29, %v760_v30  ;;  %v750_v34 = vmul.f32 %v1072_v32, %v738_v31 }
 0x496   : > { %v775_v35 = vadd.f32 %v771_v33, %v1392_v53  ;;  %v761_v37 = vmul.f32 %v910_v27, %v750_v34 }
 0x497   : > { %v1074_v38 = vpop.eup %1073 }
 0x498   : > { %v772_v39 = vadd.f32 %v911_v29, %v761_v37  ;;  %v751_v40 = vmul.f32 %v1074_v38, %v739_v36  ;;  %779 = vst [vmem:[%s257_s15] sm:$0xff] %v775_v35 }
 0x49a   : > { %v776_v41 = vadd.f32 %v772_v39, %v1398_v57  ;;  %v762_v42 = vmul.f32 %v910_v27, %v751_v40 }
 0x49b   : > { %v1076_v44 = vpop.eup %1075 }
 0x49c   : > { %v773_v45 = vadd.f32 %v911_v29, %v762_v42  ;;  %v752_v46 = vmul.f32 %v1076_v44, %v740_v43  ;;  %780 = vst [vmem:[%s257_s15 + $0x8] sm:$0xff] %v776_v41 }
 0x49e   : > { %v777_v53 = vadd.f32 %v773_v45, %v1390_v51  ;;  %v763_v47 = vmul.f32 %v910_v27, %v752_v46 }
 0x4a0   : > { %v774_v48 = vadd.f32 %v911_v29, %v763_v47  ;;  %781 = vst [vmem:[%s257_s15 + $0x10] sm:$0xff] %v777_v53 }
 0x4a2   : > { %v778_v57 = vadd.f32 %v774_v48, %v1394_v54 }
 0x4a4   : > { %782 = vst [vmem:[%s257_s15 + $0x18] sm:$0xff] %v778_v57 }
 0x4a5   : > { %1144 = shalt.err (!%p1141_p0)
}
 0x4a6   : > { %s1145_s26 = scalar_lea.hbm %s1427_s10, 512  ;;  %s1149_s7 = scalar_lea.hbm %s1478_s5, 1024 }
 0x4a7   : > { %p1146_p5 = scmp.ne.s32.totalorder %s1427_s10, %s1145_s26  ;;  %p1150_p4 = scmp.lt.s32.totalorder %s1427_s10, %s1478_s5 }
 0x4a8   : > { %p1151_p6 = scmp.lt.s32.totalorder %s1149_s7, %s1145_s26 }
 0x4a9   : > { %p1147_p9 = pnand %p1146_p5, %p1494_p11 }
 0x4aa   : > { %p1152_p8 = por %p1151_p6, %p1150_p4 }
 0x4ab   : > { %p1148_p1 = pneg %p1147_p9 }
 0x4ad   : > { %p1153_p3 = pnand %p1152_p8, %p1148_p1 }
 0x4af   : > { %1156 = shalt.err (!%p1153_p3)
}
 0x4b0   : > { %s1211_s23 = smov 128   ;;  %s1212_s28 = smov 8  }
 0x4b1   : > { %977 = dma.vmem_to_hbm [thread:$0]  (%p1494_p11), %s1429_s27, 512, %s1427_s10, %s784_s12, %s1211_s23, %s1211_s23, %s1212_s28  }
 0x4b2 PF: > { %s813_s9 = sand.u32 1, %s1187_s18   ;;  %p1495_p7 = scmp.ne.s32.totalorder %s1484_s25, 0 }
 0x4b3   : > { %p1496_p12 = scmp.ge.s32.totalorder %s1199_s21, 2  ;;  %s814_s16 = scalar_lea.sflag [#allocation4], %s813_s9 }
 0x4b5   : > { %p988_p10 = pnand %p1496_p12, %p1495_p7 }
 0x4b7   : > { %p989_p2 = pneg %p988_p10 }
 0x4b9   : > { %1182 = dma.done.wait (%p989_p2), %s814_s16, 512  }
 0x4ba   : > { %1184 = vsyncadd (%p989_p2), %s814_s16, 4294966784  ;;  %p19_p13 = scmp.ge.s32.totalorder %s1297_s30, 4   ;;  %s1497_s18 = smov %s1191_s19 }
 0x4bb   : > { %s1498_s19 = smov %s1195_s20  ;;  %s1499_s20 = smov %s1314_s13 }
 0x4bc   : > { %s1500_s21 = smov %s1297_s30  ;;  %21 = sbr.rel (!%p19_p13) target bundleno = 6 (0x6), region = 89 }
 0x4c1   :  { %819 = vsyncpa [#allocation3], 1 }
 0x4c2   :  { %821 = vsyncpa [#allocation3 + $0x1], 1 }
 0x4c3   :  { %822 = vsyncpa [#allocation6], 1 }
 0x4c4   :  { %823 = vsyncpa [#allocation4], 1 }
 0x4c5   :  { %825 = vsyncpa [#allocation4 + $0x1], 1 }

</bundles_post_ra>
